<compile_context>
chip_gen: v7x
topology: tpu7x:2x2x1
jax: 0.10.0
libtpu: 0.0.40
codegen_flags: <defaults>
</compile_context>

<pallas_src>
import functools

import jax
import jax.numpy as jnp
from jax.experimental import pallas as pl
from jax.experimental.pallas import tpu as pltpu


def _conv_bn_silu_kernel(x_ref, w_ref, shift_ref, o_ref, *, K, TH, W, im2col):
    # x_ref:     (1, Hp, Wp, Cin)        padded input image (resident per batch)
    # w_ref:     im2col: (K*K*Cin, Coutp)   BN-scale-folded bf16 weights
    #            per-tap: (K, K, Cin, Coutp)
    # shift_ref: (1, Coutp)              folded BN shift (f32)
    # o_ref:     (1, TH, W, Coutp)       output row tile (lane-dense last dim)
    coutp = o_ref.shape[-1]
    THK = TH + K - 1

    # Row window for this grid step; cast the whole slab to bf16 once (hoisted).
    r = pl.program_id(1)
    row0 = pl.multiple_of(r * TH, TH)
    xin = x_ref[0, pl.ds(row0, THK), :, :].astype(jnp.bfloat16)   # (THK, Wp, Cin)
    cin = xin.shape[-1]

    if im2col:
        # Build the (TH, W, K*K*Cin) im2col tile from K*K shifted views and do a
        # single bf16 matmul with f32 accumulation on the MXU.
        cols = []
        for kh in range(K):
            for kw in range(K):
                cols.append(xin[kh:kh + TH, kw:kw + W, :])        # (TH, W, Cin)
        patch = jnp.concatenate(cols, axis=-1)                    # (TH, W, K*K*Cin)
        patch2d = patch.reshape(TH * W, K * K * cin)
        acc = jnp.dot(patch2d, w_ref[...],
                      preferred_element_type=jnp.float32)         # (TH*W, Coutp)
    else:
        # Large-Cin path: per-tap matmuls, contraction = Cin (>= 128).
        w_all = w_ref[...]                                        # (K, K, Cin, Coutp) bf16
        acc = jnp.zeros((TH * W, coutp), dtype=jnp.float32)
        for kh in range(K):
            for kw in range(K):
                patch2d = xin[kh:kh + TH, kw:kw + W, :].reshape(TH * W, cin)
                acc = acc + jnp.dot(patch2d, w_all[kh, kw],
                                    preferred_element_type=jnp.float32)

    # Fused BN shift (scale already folded into the weights) + SiLU, in f32.
    y = acc + shift_ref[...].astype(jnp.float32)                  # (TH*W, Coutp)
    y = y * jax.nn.sigmoid(y)                                     # SiLU
    o_ref[0, :, :, :] = y.reshape(TH, W, coutp).astype(o_ref.dtype)


def _pick_tile_h(H, W):
    """Largest divisor of H keeping the matmul M-dim (tile_h*W) around ~1K rows."""
    target = max(1, 1024 // max(W, 1))
    th = 1
    for d in range(1, H + 1):
        if H % d == 0 and d <= target:
            th = d
    return th


def conv_bn_silu(x_nchw, weight_oihw, gamma, beta, running_mean, running_var,
                 *, eps=1e-5, k=3, tile_h=None, out_dtype=None):
    """Pallas equivalent of Conv.forward (Conv2d k, s=1, p=k//2 + BN + SiLU).

    Accepts/returns NCHW to match the PyTorch module. For an NHWC pipeline
    (and/or bf16 outputs) call with out_dtype=jnp.bfloat16 and drop the
    transposes below.
    """
    N, Cin, H, W = x_nchw.shape
    Cout = weight_oihw.shape[0]
    K = k
    pad = K // 2                                   # autopad(k) with d=1, p=None
    out_dtype = x_nchw.dtype if out_dtype is None else out_dtype

    if tile_h is None:
        tile_h = _pick_tile_h(H, W)
    assert H % tile_h == 0, "tile_h must divide H"
    TH = tile_h
    R = H // TH

    # Lane-dense output channels.
    Coutp = -(-Cout // 128) * 128

    # ---- BN folding (inference form) ----
    scale = (gamma / jnp.sqrt(running_var + eps)).astype(jnp.float32)   # (Cout,)
    shift = (beta - running_mean * scale).astype(jnp.float32)           # (Cout,)
    shift_p = jnp.zeros((1, Coutp), jnp.float32).at[0, :Cout].set(shift)

    # ---- weights: OIHW -> (kh, kw, ci, co), fold BN scale, pad Cout, bf16 ----
    w_khkwio = jnp.transpose(weight_oihw, (2, 3, 1, 0)).astype(jnp.float32)
    w_khkwio = w_khkwio * scale[None, None, None, :]
    w_khkwio = jnp.pad(w_khkwio, ((0, 0), (0, 0), (0, 0), (0, Coutp - Cout)))
    w_khkwio = w_khkwio.astype(jnp.bfloat16)

    use_im2col = Cin < 128
    if use_im2col:
        w_arg = w_khkwio.reshape(K * K * Cin, Coutp)
        w_spec = pl.BlockSpec((K * K * Cin, Coutp), lambda n, r: (0, 0))
    else:
        w_arg = w_khkwio
        w_spec = pl.BlockSpec((K, K, Cin, Coutp), lambda n, r: (0, 0, 0, 0))

    # ---- layout + 'same' padding (glue) ----
    x_nhwc = jnp.transpose(x_nchw, (0, 2, 3, 1))                        # NCHW -> NHWC
    x_pad = jnp.pad(x_nhwc, ((0, 0), (pad, pad), (pad, pad), (0, 0)))
    Hp, Wp = H + 2 * pad, W + 2 * pad

    kernel = functools.partial(_conv_bn_silu_kernel,
                               K=K, TH=TH, W=W, im2col=use_im2col)

    out_nhwc = pl.pallas_call(
        kernel,
        out_shape=jax.ShapeDtypeStruct((N, H, W, Coutp), out_dtype),
        grid_spec=pltpu.PrefetchScalarGridSpec(
            num_scalar_prefetch=0,
            grid=(N, R),
            in_specs=[
                # Padded image: constant block index along r -> DMA'd once per n,
                # stays resident while the row tiles are computed.
                pl.BlockSpec((1, Hp, Wp, Cin), lambda n, r: (n, 0, 0, 0)),
                w_spec,
                pl.BlockSpec((1, Coutp), lambda n, r: (0, 0)),
            ],
            out_specs=pl.BlockSpec((1, TH, W, Coutp), lambda n, r: (n, r, 0, 0)),
        ),
        compiler_params=pltpu.CompilerParams(
            # Both axes are independent; spatial axis feeds both TCs on v7x.
            # For very large images on v7x (64 MiB VMEM), shrink tile_h and/or
            # set vmem_limit_bytes explicitly.
            dimension_semantics=("parallel", "parallel")),
    )(x_pad, w_arg, shift_p)

    out_nhwc = out_nhwc[..., :Cout]                                     # drop lane padding
    return jnp.transpose(out_nhwc, (0, 3, 1, 2))                        # NHWC -> NCHW


def _reference(x_nchw, weight_oihw, gamma, beta, running_mean, running_var, eps=1e-5):
    """Pure-JAX f32 reference (conv + BN + SiLU) for correctness checking."""
    y = jax.lax.conv_general_dilated(
        x_nchw, weight_oihw,
        window_strides=(1, 1), padding="SAME",
        dimension_numbers=("NCHW", "OIHW", "NCHW"))
    scale = gamma / jnp.sqrt(running_var + eps)
    shift = beta - running_mean * scale
    y = y * scale[None, :, None, None] + shift[None, :, None, None]
    return y * jax.nn.sigmoid(y)


if __name__ == "__main__":
    key = jax.random.PRNGKey(0)
    kx, kw, kg, kb, km, kv = jax.random.split(key, 6)

    # Module config: Conv(c1=4, c2=8, k=3) -> stride 1, pad 1, groups 1, dilation 1
    N, Cin, H, W = 2, 4, 16, 16
    Cout, K = 8, 3

    x = jax.random.normal(kx, (N, Cin, H, W), dtype=jnp.float32)
    weight = jax.random.normal(kw, (Cout, Cin, K, K), dtype=jnp.float32) * 0.1
    gamma = 1.0 + 0.1 * jax.random.normal(kg, (Cout,), dtype=jnp.float32)
    beta = 0.1 * jax.random.normal(kb, (Cout,), dtype=jnp.float32)
    running_mean = 0.1 * jax.random.normal(km, (Cout,), dtype=jnp.float32)
    running_var = jnp.abs(1.0 + 0.1 * jax.random.normal(kv, (Cout,), dtype=jnp.float32))

    ref = _reference(x, weight, gamma, beta, running_mean, running_var)

    # Row-tiled path (grid = (2, 2)).
    out = conv_bn_silu(x, weight, gamma, beta, running_mean, running_var, tile_h=8)
    out = jax.block_until_ready(out)
    assert out.shape == (N, Cout, H, W)
    max_err = float(jnp.max(jnp.abs(out - ref)))
    # bf16 matmul inputs with f32 accumulation -> loosened tolerance vs f32 reference.
    assert jnp.allclose(out, ref, atol=5e-2, rtol=5e-2), f"mismatch, max err {max_err}"

    # Default tiling path (single row tile per batch element).
    out2 = jax.block_until_ready(
        conv_bn_silu(x, weight, gamma, beta, running_mean, running_var))
    assert jnp.allclose(out2, ref, atol=5e-2, rtol=5e-2), "mismatch (default tile_h)"

    print("KERNEL_OK")
</pallas_src>

<mosaic_0001>
module attributes {stable_mosaic.version = 11 : i64} {
  func.func @_conv_bn_silu_kernel(%arg0: i32, %arg1: i32, %arg2: memref<1x18x18x4xf32, #tpu.memory_space<vmem>>, %arg3: memref<36x128xbf16, #tpu.memory_space<vmem>>, %arg4: memref<1x128xf32, #tpu.memory_space<vmem>>, %arg5: memref<1x8x16x128xf32, #tpu.memory_space<vmem>>) attributes {dimension_semantics = [#tpu.dimension_semantics<parallel>, #tpu.dimension_semantics<parallel>], iteration_bounds = array<i64: 2, 2>, scalar_prefetch = 0 : i64, scratch_operands = 0 : i64, tpu.core_type = #tpu.core_type<tc>, window_params = [{transform_indices = @transform_0, window_bounds = array<i64: 1, 18, 18, 4>}, {pipeline_mode = #tpu.pipeline_mode<synchronous>, transform_indices = @transform_1, window_bounds = array<i64: 36, 128>}, {pipeline_mode = #tpu.pipeline_mode<synchronous>, transform_indices = @transform_2, window_bounds = array<i64: 1, 128>}, {transform_indices = @transform_3, window_bounds = array<i64: 1, 8, 16, 128>}]} {
    %c8_i32 = arith.constant 8 : i32
    %0 = arith.muli %arg1, %c8_i32 : i32
    %1 = tpu.assume_multiple %0, 8 : i32
    %c0 = arith.constant 0 : index
    %2 = arith.index_cast %1 : i32 to index
    %c0_0 = arith.constant 0 : index
    %c0_1 = arith.constant 0 : index
    %3 = vector.load %arg2[%c0, %2, %c0_0, %c0_1] : memref<1x18x18x4xf32, #tpu.memory_space<vmem>>, vector<1x10x18x4xf32>
    %4 = vector.shape_cast %3 : vector<1x10x18x4xf32> to vector<10x18x4xf32>
    %5 = arith.truncf %4 : vector<10x18x4xf32> to vector<10x18x4xbf16>
    %6 = vector.extract_strided_slice %5 {offsets = [0, 0, 0], sizes = [8, 16, 4], strides = [1, 1, 1]} : vector<10x18x4xbf16> to vector<8x16x4xbf16>
    %7 = vector.extract_strided_slice %5 {offsets = [0, 1, 0], sizes = [8, 16, 4], strides = [1, 1, 1]} : vector<10x18x4xbf16> to vector<8x16x4xbf16>
    %8 = vector.extract_strided_slice %5 {offsets = [0, 2, 0], sizes = [8, 16, 4], strides = [1, 1, 1]} : vector<10x18x4xbf16> to vector<8x16x4xbf16>
    %9 = vector.extract_strided_slice %5 {offsets = [1, 0, 0], sizes = [8, 16, 4], strides = [1, 1, 1]} : vector<10x18x4xbf16> to vector<8x16x4xbf16>
    %10 = vector.extract_strided_slice %5 {offsets = [1, 1, 0], sizes = [8, 16, 4], strides = [1, 1, 1]} : vector<10x18x4xbf16> to vector<8x16x4xbf16>
    %11 = vector.extract_strided_slice %5 {offsets = [1, 2, 0], sizes = [8, 16, 4], strides = [1, 1, 1]} : vector<10x18x4xbf16> to vector<8x16x4xbf16>
    %12 = vector.extract_strided_slice %5 {offsets = [2, 0, 0], sizes = [8, 16, 4], strides = [1, 1, 1]} : vector<10x18x4xbf16> to vector<8x16x4xbf16>
    %13 = vector.extract_strided_slice %5 {offsets = [2, 1, 0], sizes = [8, 16, 4], strides = [1, 1, 1]} : vector<10x18x4xbf16> to vector<8x16x4xbf16>
    %14 = vector.extract_strided_slice %5 {offsets = [2, 2, 0], sizes = [8, 16, 4], strides = [1, 1, 1]} : vector<10x18x4xbf16> to vector<8x16x4xbf16>
    %15 = tpu.concatenate %6, %7, %8, %9, %10, %11, %12, %13, %14 in 2 : vector<8x16x4xbf16>, vector<8x16x4xbf16>, vector<8x16x4xbf16>, vector<8x16x4xbf16>, vector<8x16x4xbf16>, vector<8x16x4xbf16>, vector<8x16x4xbf16>, vector<8x16x4xbf16>, vector<8x16x4xbf16> -> vector<8x16x36xbf16>
    %16 = vector.shape_cast %15 : vector<8x16x36xbf16> to vector<128x36xbf16>
    %c0_2 = arith.constant 0 : index
    %c0_3 = arith.constant 0 : index
    %17 = vector.load %arg3[%c0_2, %c0_3] : memref<36x128xbf16, #tpu.memory_space<vmem>>, vector<36x128xbf16>
    %cst = arith.constant dense<0.000000e+00> : vector<128x128xf32>
    %18 = tpu.matmul %16, %17, %cst {dimension_numbers = #tpu.dot_dimension_numbers<[1], [0], [0], [1], [0, 0, 1, 1], [], []>} : vector<128x36xbf16>, vector<36x128xbf16>, vector<128x128xf32> -> vector<128x128xf32>
    %c0_4 = arith.constant 0 : index
    %c0_5 = arith.constant 0 : index
    %19 = vector.load %arg4[%c0_4, %c0_5] : memref<1x128xf32, #tpu.memory_space<vmem>>, vector<1x128xf32>
    %20 = vector.broadcast %19 : vector<1x128xf32> to vector<128x128xf32>
    %21 = arith.addf %18, %20 : vector<128x128xf32>
    %22 = arith.negf %21 : vector<128x128xf32>
    %23 = math.exp %22 : vector<128x128xf32>
    %cst_6 = arith.constant 1.000000e+00 : f32
    %24 = vector.broadcast %cst_6 : f32 to vector<128x128xf32>
    %25 = arith.addf %24, %23 : vector<128x128xf32>
    %26 = arith.divf %24, %25 : vector<128x128xf32>
    %27 = arith.mulf %21, %26 : vector<128x128xf32>
    %28 = vector.shape_cast %27 : vector<128x128xf32> to vector<8x16x128xf32>
    %c0_7 = arith.constant 0 : index
    %c0_8 = arith.constant 0 : index
    %c0_9 = arith.constant 0 : index
    %c0_10 = arith.constant 0 : index
    %29 = vector.load %arg5[%c0_7, %c0_8, %c0_9, %c0_10] : memref<1x8x16x128xf32, #tpu.memory_space<vmem>>, vector<1x8x16x128xf32>
    %30 = vector.shape_cast %29 : vector<1x8x16x128xf32> to vector<8x16x128xf32>
    %31 = vector.shape_cast %28 : vector<8x16x128xf32> to vector<1x8x16x128xf32>
    tpu.vector_store %arg5[%c0_7, %c0_8, %c0_9, %c0_10], %31 {strides = array<i32>} : memref<1x8x16x128xf32, #tpu.memory_space<vmem>>, vector<1x8x16x128xf32>,
    return
  }
  func.func @transform_0(%arg0: i32, %arg1: i32) -> (i32, i32, i32, i32) {
    %c0_i32 = arith.constant 0 : i32
    %c0_i32_0 = arith.constant 0 : i32
    %c0_i32_1 = arith.constant 0 : i32
    %c0_i32_2 = arith.constant 0 : i32
    return %arg0, %c0_i32, %c0_i32_0, %c0_i32_1 : i32, i32, i32, i32
  }
  func.func @transform_1(%arg0: i32, %arg1: i32) -> (i32, i32) {
    %c0_i32 = arith.constant 0 : i32
    %c0_i32_0 = arith.constant 0 : i32
    %c0_i32_1 = arith.constant 0 : i32
    return %c0_i32, %c0_i32_0 : i32, i32
  }
  func.func @transform_2(%arg0: i32, %arg1: i32) -> (i32, i32) {
    %c0_i32 = arith.constant 0 : i32
    %c0_i32_0 = arith.constant 0 : i32
    %c0_i32_1 = arith.constant 0 : i32
    return %c0_i32, %c0_i32_0 : i32, i32
  }
  func.func @transform_3(%arg0: i32, %arg1: i32) -> (i32, i32, i32, i32) {
    %c0_i32 = arith.constant 0 : i32
    %c0_i32_0 = arith.constant 0 : i32
    %c0_i32_1 = arith.constant 0 : i32
    return %arg0, %arg1, %c0_i32, %c0_i32_0 : i32, i32, i32, i32
  }
}

</mosaic_0001>

<bundles_post_ra>
// kernel: tpu_custom_call.1
= control target key start
LH: loop header
LB: loop body
LE: loop exit
PB: predicated region body
PF: predicated region fallthrough
CT: control target
= control target key end

     0   :  { %8 = vsyncpa [#allocation3], 0  ;;  %s1947_s0 = inlined_call_operand.vmem [shape: f32[2,18,18,4], index: 0, kind: input, shape index: {}]   ;;  %s1948_s1 = inlined_call_operand.vmem [shape: bf16[36,128], index: 1, kind: input, shape index: {}]   ;;  %s1949_s2 = inlined_call_operand.vmem [shape: f32[1,128], index: 2, kind: input, shape index: {}]   ;;  %s1950_s3 = inlined_call_operand.hbm [shape: f32[2,16,16,128], index: 3, kind: output, shape index: {}]  }
   0x1   :  { %10 = vsyncpa [#allocation3 + $0x1], 0  ;;  %s1402_s12 = smov 0   ;;  %s1404_s13 = smov 0  }
   0x2   :  { %s1406_s14 = smov 0   ;;  %s1408_s15 = smov 0  }
   0x3   :  { %s1410_s16 = smov 0   ;;  %s1412_s17 = smov 0  }
   0x4   :  { %s1414_s18 = smov 0   ;;  %s1416_s19 = smov 0  }
   0x5 LB: > { %s1042_s20 = sadd.s32 4294967295, %s1370_s19   ;;  %s1043_s21 = sadd.s32 4294967294, %s1370_s19   ;;  %s1370_s19 = sphi %s1416_s19, %s16_s19   ;;  %s1366_s18 = sphi %s1414_s18, %s1959_s18   ;;  %s1362_s17 = sphi %s1412_s17, %s1958_s17   ;;  %s1358_s16 = sphi %s1410_s16, %s1957_s16   ;;  %s1354_s15 = sphi %s1408_s15, %s1956_s15   ;;  %s1350_s14 = sphi %s1406_s14, %s1955_s14   ;;  %s1346_s13 = sphi %s1404_s13, %s1954_s13   ;;  %s1342_s12 = sphi %s1402_s12, %s1953_s12  }
   0x6   : > { %s25_s22 = sadd.s32 1, %s1362_s17  ;;  %s28_s23 = sadd.s32 1, %s1366_s18 }
   0x7   : > { %p26_p0 = scmp.ge.s32.totalorder %s25_s22, 2  ;;  %p115_p1 = scmp.ne.s32.totalorder %s1350_s14, %s1346_s13 }
   0x8   : > { %p116_p2 = scmp.eq.s32.totalorder %s1042_s20, 3  ;;  %p121_p5 = scmp.ne.s32.totalorder %s1346_s13, %s1342_s12 }
   0x9   : > { %s1961_s22 = smov (%p26_p0, %s25_s22), 0  ;;  %s1963_s23 = smov (!%p26_p0, %s28_s23), %s1366_s18 }
   0xa   : > { %s101_s24 = ssub.s32 %s1362_s17, %s1961_s22  ;;  %p1453_p3 = por %p116_p2, %p115_p1 }
   0xb   : > { %p30_p4 = scmp.ge.s32.totalorder %s1963_s23, 2  ;;  %p122_p6 = scmp.eq.s32.totalorder %s1043_s21, 3 }
   0xc   : > { %p1046_p7 = scmp.ge.s32.totalorder %s1370_s19, 1  ;;  %p154_p9 = scmp.lt.s32.totalorder %s1370_s19, 5 }
   0xd   : > { %s1965_s23 = smov (%p30_p4, %s1963_s23), 0  ;;  %p1462_p8 = por %p122_p6, %p121_p5 }
   0xe   : > { %s100_s27 = ssub.s32 %s1366_s18, %s1965_s23  ;;  %s105_s28 = sadd.s32 1, %s1350_s14 }
   0xf   : > { %s102_s29 = sor.u32 %s101_s24, %s100_s27  ;;  %p155_p10 = pnand %p1046_p7, %p154_p9 }
  0x10   : > { %p103_p11 = scmp.eq.s32.totalorder %s102_s29, 0  ;;  %p178_p12 = scmp.lt.s32.totalorder (!%p155_p10), %s1358_s16, 1  ;;  %vm367_vm0 = vcmask (!%p155_p10), 1046528   ;;  %vm238_vm1 = vsmask.f32 (!%p155_p10), 7424  ;;  %vm718_vm2 = vcmask (!%p155_p10), 1041408  }
  0x11   : > { %158 = sbr.rel (%p155_p10) target bundleno = 538 (0x21a), region = 32  ;;  %s1372_s11 = smov (!%p155_p10), 12   ;;  %vm538_vm3 = vcmask (!%p155_p10), 31744   ;;  %vm555_vm4 = vcmask (!%p155_p10), 64512   ;;  %vm572_vm5 = vcmask (!%p155_p10), 97280   ;;  %vm589_vm6 = vcmask (!%p155_p10), 130048  }
  0x12   : > { %s1471_s30 = scalar_select %p103_p11, %s1350_s14, %s105_s28  }
  0x13   : > { %s1050_s5 = smul.u32 (!%p155_p10), 192, %s1354_s15  ;;  %s1373_s20 = smov (!%p155_p10), 8   ;;  %vm606_vm7 = vcmask (!%p155_p10), 162816   ;;  %vm623_vm8 = vcmask (!%p155_p10), 195584   ;;  %vm640_vm9 = vcmask (!%p155_p10), 228352   ;;  %vm657_vm10 = vcmask (!%p155_p10), 261120  }
  0x14   : > { %s1374_s21 = smov (!%p155_p10), 4   ;;  %s1375_s24 = smov (!%p155_p10), 16   ;;  %vm701_vm11 = vcmask (!%p155_p10), 293888  }
  0x15   : > { %s1376_s27 = smov (!%p155_p10), 20   ;;  %s1086_s29 = sshll.u32 (!%p155_p10), %s1354_s15, 4 }
  0x18   : > { %s179_s4 = scalar_select %p178_p12, %s1358_s16, 1 }
  0x1a   : > { %s1128_s6 = smul.u32 432, %s179_s4  ;;  %s1377_s4 = smov 24  }
  0x1c   : > { %s182_s9 = scalar_lea.vmem %s1947_s0, %s1128_s6 }
  0x1d   : > { %s1479_s10 = scalar_lea.vmem %s182_s9, %s1050_s5  ;;  %s1378_s9 = smov 28  }
  0x1e   : > { %v203_v0 = vld [vmem:[%s1479_s10 + $0x78] sm:$0xff]  ;;  %v204_v1 = vld [vmem:[%s1479_s10 + $0x80] sm:$0xff]  ;;  %v201_v6 = vld [vmem:[%s1479_s10 + $0x68] sm:$0xff] }
  0x1f   : > { %v191_v2 = vld [vmem:[%s1479_s10 + $0x18] sm:$0xff]  ;;  %v1484_v3 = vpack.c.bf16 %v204_v1, %v203_v0  ;;  %v192_v4 = vld [vmem:[%s1479_s10 + $0x20] sm:$0xff]  ;;  %v202_v8 = vld [vmem:[%s1479_s10 + $0x70] sm:$0x3] }
  0x20   : > { %v200_v5 = vld [vmem:[%s1479_s10 + $0x60] sm:$0xff]  ;;  %v1489_v7 = vpack.c.bf16 %v192_v4, %v191_v2  ;;  %v189_v11 = vld [vmem:[%s1479_s10 + $0x8] sm:$0xff]  ;;  %v227_v12 = vpack.c.bf16 %v202_v8, %v202_v8  ;;  %v190_v13 = vld [vmem:[%s1479_s10 + $0x10] sm:$0x3] }
  0x21   : > { %v1492_v9 = vpack.c.bf16 %v201_v6, %v200_v5  ;;  %v188_v10 = vld [vmem:[%s1479_s10] sm:$0xff]  ;;  %417 = vrot.lane.b32.xlu1 %v1484_v3, %s1372_s11  ;;  %v205_v15 = vld [vmem:[%s1479_s10 + $0x88] sm:$0x3]  ;;  %v383_v16 = vrot.slane %v1484_v3, 1  ;;  %v300_v17 = vshrl.u32 %v1484_v3, 16  ;;  %v219_v19 = vpack.c.bf16 %v190_v13, %v190_v13  ;;  %v206_v39 = vld [vmem:[%s1479_s10 + $0x90] sm:$0xff] }
  0x22   : > { %v1499_v14 = vpack.c.bf16 %v189_v11, %v188_v10  ;;  %409 = vrot.lane.b32.xlu0 %v1489_v7, %s1372_s11  ;;  %v229_v20 = vpack.c.bf16 %v205_v15, %v205_v15  ;;  %v193_v21 = vld [vmem:[%s1479_s10 + $0x28] sm:$0x3]  ;;  %v371_v22 = vrot.slane %v1489_v7, 1  ;;  %v381_v23 = vrot.slane %v227_v12, 1  ;;  %v207_v44 = vld [vmem:[%s1479_s10 + $0x98] sm:$0xff]  ;;  %v194_v45 = vld [vmem:[%s1479_s10 + $0x30] sm:$0xff] }
  0x23   : > { %v380_v18 = vrot.slane %v1492_v9, 1  ;;  %v221_v25 = vpack.c.bf16 %v193_v21, %v193_v21  ;;  %v252_v26 = vshrl.u32 %v1489_v7, 16  ;;  %v369_v27 = vrot.slane %v219_v19, 1  ;;  %v195_v46 = vld [vmem:[%s1479_s10 + $0x38] sm:$0xff]  ;;  %v208_v61 = vld [vmem:[%s1479_s10 + $0xa0] sm:$0x3] }
  0x24   : > { %v368_v24 = vrot.slane %v1499_v14, 1  ;;  %v384_v28 = vrot.slane %v229_v20, 1  ;;  %v254_v29 = vshll.u32 %v1489_v7, 16  ;;  %v240_v30 = vshrl.u32 %v1499_v14, 16  ;;  %v196_v62 = vld [vmem:[%s1479_s10 + $0x40] sm:$0x3] }
  0x25   : > { %v1514_v31 = vsel %vm367_vm0, %v380_v18, %v381_v23  ;;  %v372_v32 = vrot.slane %v221_v25, 1  ;;  %v259_v33 = vshll.u32 %v221_v25, 16  ;;  %v242_v34 = vshll.u32 %v1499_v14, 16  ;;  %v212_v18 = vld [vmem:[%s1479_s10 + $0xc0] sm:$0xff] }
  0x26   : > { %400 = vrot.lane.b32.xlu1 %v1514_v31, %s1373_s20  ;;  %v370_v35 = vsel %vm367_vm0, %v368_v24, %v369_v27  ;;  %v1521_v36 = vsel %vm367_vm0, %v383_v16, %v384_v28  ;;  %v256_v37 = vrot.slane %v254_v29, 1  ;;  %v247_v38 = vshll.u32 %v219_v19, 16  ;;  %v213_v19 = vld [vmem:[%s1479_s10 + $0xc8] sm:$0xff]  ;;  %v216_v27 = vld [vmem:[%s1479_s10 + $0xe0] sm:$0xff] }
  0x27   : > { %392 = vrot.lane.b32.xlu0 %v370_v35, %s1373_s20  ;;  %v1526_v40 = vsel %vm367_vm0, %v371_v22, %v372_v32  ;;  %v261_v41 = vrot.slane %v259_v33, 1  ;;  %v244_v42 = vrot.slane %v242_v34, 1  ;;  %v302_v43 = vshll.u32 %v1484_v3, 16  ;;  %v217_v29 = vld [vmem:[%s1479_s10 + $0xe8] sm:$0x3] }
  0x28   : > { %v257_v47 = vor.u32 %v256_v37, %v252_v26  ;;  %v249_v48 = vrot.slane %v247_v38, 1  ;;  %v307_v49 = vshll.u32 %v229_v20, 16  ;;  %v288_v50 = vshrl.u32 %v1492_v9, 16  ;;  %v214_v20 = vld [vmem:[%s1479_s10 + $0xd0] sm:$0x3]  ;;  %v215_v26 = vld [vmem:[%s1479_s10 + $0xd8] sm:$0xff] }
  0x29   : > { %v245_v51 = vor.u32 %v244_v42, %v240_v30  ;;  %v304_v52 = vrot.slane %v302_v43, 1  ;;  %v290_v53 = vshll.u32 %v1492_v9, 16  ;;  %v295_v54 = vshll.u32 %v227_v12, 16 }
  0x2a   : > { %402 = vrot.lane.b32.xlu1 %v1521_v36, %s1373_s20  ;;  %v1536_v55 = vpack.c.bf16 %v207_v44, %v206_v39  ;;  %v1538_v56 = vpack.c.bf16 %v195_v46, %v194_v45  ;;  %v262_v57 = vsel %vm238_vm1, %v257_v47, %v261_v41  ;;  %v309_v59 = vrot.slane %v307_v49, 1 }
  0x2b   : > { %394 = vrot.lane.b32.xlu0 %v1526_v40, %s1373_s20  ;;  %v305_v58 = vor.u32 %v304_v52, %v300_v17  ;;  %v292_v60 = vrot.slane %v290_v53, 1  ;;  %v250_v63 = vsel %vm238_vm1, %v245_v51, %v249_v48  ;;  %v297_v0 = vrot.slane %v295_v54, 1 }
  0x2c   : > { %v314_v2 = vshll.u32 %v1536_v55, 16  ;;  %v1548_v4 = vpack.c.bf16 %v208_v61, %v208_v61  ;;  %v1550_v5 = vpack.c.bf16 %v196_v62, %v196_v62  ;;  %v266_v6 = vshll.u32 %v1538_v56, 16  ;;  %v209_v62 = vld [vmem:[%s1479_s10 + $0xa8] sm:$0xff] }
  0x2d   : > { %v293_v1 = vor.u32 %v292_v60, %v288_v50  ;;  %v1555_v8 = vsel %vm238_vm1, %v305_v58, %v309_v59  ;;  %v312_v11 = vshrl.u32 %v1536_v55, 16  ;;  %v264_v15 = vshrl.u32 %v1538_v56, 16 }
  0x2e   : > { %337 = vrot.lane.b32.xlu1 %v262_v57, %s1374_s21  ;;  %v316_v12 = vrot.slane %v314_v2, 1  ;;  %v319_v13 = vshll.u32 %v1548_v4, 16  ;;  %v268_v16 = vrot.slane %v266_v6, 1  ;;  %v271_v17 = vshll.u32 %v1550_v5, 16 }
  0x2f   : > { %335 = vrot.lane.b32.xlu0 %v250_v63, %s1374_s21  ;;  %v1558_v10 = vsel %vm238_vm1, %v293_v1, %v297_v0  ;;  %v1573_v25 = vpack.c.bf16 %v213_v19, %v212_v18  ;;  %v235_v28 = vpack.c.bf16 %v214_v20, %v214_v20  ;;  %v1583_v37 = vpack.c.bf16 %v216_v27, %v215_v26  ;;  %v210_v63 = vld [vmem:[%s1479_s10 + $0xb0] sm:$0xff]  ;;  %v197_v0 = vld [vmem:[%s1479_s10 + $0x48] sm:$0xff]  ;;  %v1209_v18 = vld [vmem:[%s1948_s1] sm:$0xff]  }
  0x30   : > { %v317_v21 = vor.u32 %v316_v12, %v312_v11  ;;  %v321_v22 = vrot.slane %v319_v13, 1  ;;  %v269_v23 = vor.u32 %v268_v16, %v264_v15  ;;  %v273_v24 = vrot.slane %v271_v17, 1  ;;  %v198_v1 = vld [vmem:[%s1479_s10 + $0x50] sm:$0xff]  ;;  %v211_v12 = vld [vmem:[%s1479_s10 + $0xb8] sm:$0x3]  ;;  %1098 = vmatprep.subr.bf16.mxu0 %v1209_v18  ;;  %1120 = vmatprep.subr.bf16.mxu1 %v1209_v18  ;;  %v1210_v26 = vld [vmem:[%s1948_s1 + $0x8] sm:$0xff]  }
  0x31   : > { %v426_v30 = vshrl.u32 %v1573_v25, 16  ;;  %v428_v32 = vshll.u32 %v1573_v25, 16  ;;  %v454_v33 = vrot.slane %v1573_v25, 1  ;;  %v433_v34 = vshll.u32 %v235_v28, 16  ;;  %v199_v13 = vld [vmem:[%s1479_s10 + $0x58] sm:$0x3]  ;;  %1099 = vmatpush3.bf16.msra.mxu0 %v1209_v18  ;;  %1123 = vmatpush3.bf16.msra.mxu1 %v1209_v18 }
  0x32   : > { %345 = vrot.lane.b32.xlu1 %v1555_v8, %s1374_s21  ;;  %v455_v35 = vrot.slane %v235_v28, 1  ;;  %v1588_v38 = vsel %vm238_vm1, %v317_v21, %v321_v22  ;;  %v1591_v39 = vsel %vm238_vm1, %v269_v23, %v273_v24  ;;  %v237_v42 = vpack.c.bf16 %v217_v29, %v217_v29  ;;  %1100 = vmatprep.subr.bf16.mxu0 %v1210_v26  ;;  %s1379_s10 = smov 32  }
  0x33   : > { %343 = vrot.lane.b32.xlu0 %v1558_v10, %s1374_s21  ;;  %v430_v41 = vrot.slane %v428_v32, 1  ;;  %v435_v43 = vrot.slane %v433_v34, 1  ;;  %v491_v45 = vshrl.u32 %v1583_v37, 16  ;;  %v493_v46 = vshll.u32 %v1583_v37, 16  ;;  %1121 = vmatprep.subr.bf16.mxu1 %v1210_v26 }
  0x34   : > { %v1595_v44 = vsel %vm367_vm0, %v454_v33, %v455_v35  ;;  %v498_v48 = vshll.u32 %v237_v42, 16  ;;  %v519_v49 = vrot.slane %v1583_v37, 1  ;;  %v520_v50 = vrot.slane %v237_v42, 1  ;;  %v1211_v32 = vld [vmem:[%s1948_s1 + $0x10] ss:$0 sps:$4 sm:$0x33]  }
  0x35   : > { %v431_v47 = vor.u32 %v430_v41, %v426_v30  ;;  %v495_v51 = vrot.slane %v493_v46, 1  ;;  %v387_v58 = vrot.slane %v1548_v4, 1  ;;  %v374_v60 = vrot.slane %v1538_v56, 1  ;;  %1101 = vmatpush3.bf16.msra.mxu0 %v1210_v26  ;;  %1124 = vmatpush3.bf16.msra.mxu1 %v1210_v26 }
  0x36   : > { %419 = vrot.lane.b32.xlu1 %v1536_v55, %s1372_s11  ;;  %v500_v53 = vrot.slane %v498_v48, 1  ;;  %v1606_v54 = vsel %vm367_vm0, %v519_v49, %v520_v50  ;;  %v375_v61 = vrot.slane %v1550_v5, 1  ;;  %v1628_v6 = vpack.c.bf16 %v210_v63, %v209_v62  ;;  %1126 = vmatprep.subr.msk.bf16.mxu0 %vm718_vm2, %v1211_v32 }
  0x37   : > { %411 = vrot.lane.b32.xlu0 %v1538_v56, %s1372_s11  ;;  %v1603_v52 = vsel %vm238_vm1, %v431_v47, %v435_v43  ;;  %v496_v59 = vor.u32 %v495_v51, %v491_v45  ;;  %v1633_v11 = vpack.c.bf16 %v198_v1, %v197_v0  ;;  %v233_v15 = vpack.c.bf16 %v211_v12, %v211_v12 }
  0x38   : > { %v1631_v5 = vsel %vm367_vm0, %v374_v60, %v375_v61  ;;  %v225_v16 = vpack.c.bf16 %v199_v13, %v199_v13  ;;  %v324_v19 = vshrl.u32 %v1628_v6, 16  ;;  %v720_v34 = vsel %vm718_vm2, %v1211_v32, 0  ;;  %1127 = vmatprep.subr.msk.bf16.mxu1 %vm718_vm2, %v1211_v32 }
  0x39   : > { %v1619_v2 = vsel %vm238_vm1, %v496_v59, %v500_v53  ;;  %v278_v17 = vshll.u32 %v1633_v11, 16  ;;  %v331_v21 = vshll.u32 %v233_v15, 16  ;;  %v276_v22 = vshrl.u32 %v1633_v11, 16  ;;  %1103 = vmatpush3.bf16.msra.mxu0 %v720_v34  ;;  %1125 = vmatpush3.bf16.msra.mxu1 %v720_v34 }
  0x3a   : > { %445 = vrot.lane.b32.xlu1 %v1555_v8, %s1375_s24  ;;  %v283_v24 = vshll.u32 %v225_v16, 16  ;;  %v389_v41 = vrot.slane %v1628_v6, 1  ;;  %v390_v42 = vrot.slane %v233_v15, 1  ;;  %v377_v43 = vrot.slane %v1633_v11, 1 }
  0x3b   : > { %437 = vrot.lane.b32.xlu0 %v262_v57, %s1375_s24  ;;  %v386_v57 = vrot.slane %v1536_v55, 1  ;;  %v280_v23 = vrot.slane %v278_v17, 1  ;;  %v333_v28 = vrot.slane %v331_v21, 1  ;;  %v378_v45 = vrot.slane %v225_v16, 1 }
  0x3c   : > { %v285_v30 = vrot.slane %v283_v24, 1  ;;  %v391_v46 = vsel %vm367_vm0, %v389_v41, %v390_v42 }
  0x3d   : > { %v1626_v4 = vsel %vm367_vm0, %v386_v57, %v387_v58  ;;  %v281_v29 = vor.u32 %v280_v23, %v276_v22  ;;  %v379_v47 = vsel %vm367_vm0, %v377_v43, %v378_v45 }
  0x3e   : > { %447 = vrot.lane.b32.xlu1 %v1588_v38, %s1375_s24 }
  0x3f   : > { %439 = vrot.lane.b32.xlu0 %v1591_v39, %s1375_s24  ;;  %v286_v35 = vsel %vm238_vm1, %v281_v29, %v285_v30 }
  0x42   : > { %465 = vrot.lane.b32.xlu1 %v1521_v36, %s1376_s27 }
  0x43   : > { %457 = vrot.lane.b32.xlu0 %v1526_v40, %s1376_s27  ;;  %v326_v40 = vshll.u32 %v1628_v6, 16 }
  0x45   : > { %v328_v20 = vrot.slane %v326_v40, 1 }
  0x46   : > { %467 = vrot.lane.b32.xlu1 %v1626_v4, %s1376_s27 }
  0x47   : > { %459 = vrot.lane.b32.xlu0 %v1631_v5, %s1376_s27  ;;  %v329_v27 = vor.u32 %v328_v20, %v324_v19 }
  0x49   : > { %v334_v33 = vsel %vm238_vm1, %v329_v27, %v333_v28 }
  0x4a   : > { %482 = vrot.lane.b32.xlu1 %v1536_v55, %s1377_s4 }
  0x4b   : > { %474 = vrot.lane.b32.xlu0 %v1538_v56, %s1377_s4 }
  0x4e   : > { %484 = vrot.lane.b32.xlu1 %v1628_v6, %s1377_s4 }
  0x4f   : > { %476 = vrot.lane.b32.xlu0 %v1633_v11, %s1377_s4 }
  0x52   : > { %510 = vrot.lane.b32.xlu1 %v1588_v38, %s1378_s9 }
  0x53   : > { %502 = vrot.lane.b32.xlu0 %v1591_v39, %s1378_s9 }
  0x56   : > { %512 = vrot.lane.b32.xlu1 %v334_v33, %s1378_s9 }
  0x57   : > { %504 = vrot.lane.b32.xlu0 %v286_v35, %s1378_s9 }
  0x5a   : > { %530 = vrot.lane.b32.xlu1 %v1626_v4, %s1379_s10 }
  0x5b   : > { %522 = vrot.lane.b32.xlu0 %v1631_v5, %s1379_s10 }
  0x5e   : > { %347 = vrot.lane.b32.xlu1 %v1588_v38, %s1374_s21 }
  0x5f   : > { %339 = vrot.lane.b32.xlu0 %v1591_v39, %s1374_s21 }
  0x62   : > { %532 = vrot.lane.b32.xlu1 %v391_v46, %s1379_s10 }
  0x63   : > { %524 = vrot.lane.b32.xlu0 %v379_v47, %s1379_s10 }
  0x66   : > { %349 = vrot.lane.b32.xlu1 %v334_v33, %s1374_s21 }
  0x67   : > { %341 = vrot.lane.b32.xlu0 %v286_v35, %s1374_s21 }
  0x6a   : > { %404 = vrot.lane.b32.xlu1 %v1626_v4, %s1373_s20 }
  0x6b   : > { %396 = vrot.lane.b32.xlu0 %v1631_v5, %s1373_s20 }
  0x6e   : > { %406 = vrot.lane.b32.xlu1 %v391_v46, %s1373_s20 }
  0x6f   : > { %398 = vrot.lane.b32.xlu0 %v379_v47, %s1373_s20 }
  0x72   : > { %421 = vrot.lane.b32.xlu1 %v1628_v6, %s1372_s11 }
  0x73   : > { %413 = vrot.lane.b32.xlu0 %v1633_v11, %s1372_s11 }
  0x76   : > { %423 = vrot.lane.b32.xlu1 %v1573_v25, %s1372_s11 }
  0x77   : > { %415 = vrot.lane.b32.xlu0 %v1492_v9, %s1372_s11  ;;  %s1380_s11 = smov [#allocation2]  }
  0x78   : > { %s1280_s21 = sshll.u32 %s1380_s11, 4  ;;  %s1281_s21 = int_to_ptr.vmem [resolvable:$false] %s1280_s21 }
  0x7a   : > { %449 = vrot.lane.b32.xlu1 %v334_v33, %s1375_s24 }
  0x7b   : > { %441 = vrot.lane.b32.xlu0 %v286_v35, %s1375_s24 }
  0x7e   : > { %451 = vrot.lane.b32.xlu1 %v1603_v52, %s1375_s24 }
  0x7f   : > { %443 = vrot.lane.b32.xlu0 %v1558_v10, %s1375_s24  ;;  %s175_s24 = sand.u32 1, %s1346_s13  }
  0x82   : > { %469 = vrot.lane.b32.xlu1 %v391_v46, %s1376_s27 }
  0x83   : > { %461 = vrot.lane.b32.xlu0 %v379_v47, %s1376_s27 }
  0x86   : > { %471 = vrot.lane.b32.xlu1 %v1595_v44, %s1376_s27 }
  0x87   : > { %463 = vrot.lane.b32.xlu0 %v1514_v31, %s1376_s27  ;;  %s1047_s27 = sshll.u32 %s175_s24, 7 }
  0x88   : > { %s1841_s28 = scalar_lea.vmem [#allocation2], %s1047_s27  ;;  %s1282_s27 = scalar_lea.vmem %s1281_s21, 4096 }
  0x8a   : > { %486 = vrot.lane.b32.xlu1 %v1573_v25, %s1377_s4 }
  0x8b   : > { %478 = vrot.lane.b32.xlu0 %v1492_v9, %s1377_s4 }
  0x8e   : > { %488 = vrot.lane.b32.xlu1 %v1583_v37, %s1377_s4 }
  0x8f   : > { %480 = vrot.lane.b32.xlu0 %v1484_v3, %s1377_s4  ;;  %s1082_s4 = sshll.u32 %s1358_s16, 5  ;;  %s964_s16 = sshll.u32 %s1841_s28, 4  ;;  %s1888_s16 = int_to_ptr.vmem [resolvable:$true] %s964_s16 }
  0x90   : > { %s961_s5 = sadd.s32 %s1086_s29, %s1082_s4  ;;  %p1283_p2 = scmp.lt.s32.totalorder %s1888_s16, %s1281_s21 }
  0x91   : > { %s1083_s15 = sshll.u32 %s961_s5, 7 }
  0x92   : > { %514 = vrot.lane.b32.xlu1 %v1603_v52, %s1378_s9  ;;  %s1884_s8 = scalar_lea.hbm %s1950_s3, %s1083_s15 }
  0x93   : > { %506 = vrot.lane.b32.xlu0 %v1558_v10, %s1378_s9  ;;  %v418_v38 = vpop.permute.xlu1 %417 }
  0x94   : > { %v410_v39 = vpop.permute.xlu0 %409 }
  0x96   : > { %516 = vrot.lane.b32.xlu1 %v1619_v2, %s1378_s9 }
  0x97   : > { %508 = vrot.lane.b32.xlu0 %v1555_v8, %s1378_s9  ;;  %s1894_s9 = scalar_lea.sflag [#allocation3], %s175_s24 }
  0x98   : > { %v401_v25 = vpop.permute.xlu1 %400 }
  0x99   : > { %v393_v48 = vpop.permute.xlu0 %392 }
  0x9a   : > { %534 = vrot.lane.b32.xlu1 %v1595_v44, %s1379_s10 }
  0x9b   : > { %526 = vrot.lane.b32.xlu0 %v1514_v31, %s1379_s10 }
  0x9c   : > { %v403_v37 = vpop.permute.xlu1 %402 }
  0x9d   : > { %v395_v49 = vpop.permute.xlu0 %394 }
  0x9e   : > { %536 = vrot.lane.b32.xlu1 %v1606_v54, %s1379_s10 }
  0x9f   : > { %528 = vrot.lane.b32.xlu0 %v1521_v36, %s1379_s10  ;;  %s1276_s10 = scalar_lea.vmem %s1888_s16, 2048 }
  0xa0   : > { %v338_v10 = vpop.permute.xlu1 %337  ;;  %p1277_p13 = scmp.ne.s32.totalorder %s1888_s16, %s1276_s10  ;;  %p1284_p4 = scmp.lt.s32.totalorder %s1282_s27, %s1276_s10 }
  0xa1   : > { %v336_v50 = vpop.permute.xlu0 %335  ;;  %v542_v26 = vsel %vm538_vm3, %v1489_v7, %v338_v10 }
  0xa2   : > { %v540_v2 = vsel %vm538_vm3, %v1499_v14, %v336_v50  ;;  %v559_v33 = vsel %vm555_vm4, %v542_v26, %v395_v49  ;;  %p1278_p0 = pnand %p1277_p13, %p1453_p3  ;;  %p1285_p5 = por %p1284_p4, %p1283_p2 }
  0xa3   : > { %v557_v13 = vsel %vm555_vm4, %v540_v2, %v393_v48 }
  0xa4   : > { %v346_v51 = vpop.permute.xlu1 %345  ;;  %p1279_p1 = pneg %p1278_p0 }
  0xa5   : > { %v344_v8 = vpop.permute.xlu0 %343  ;;  %v550_v21 = vsel %vm538_vm3, %v1484_v3, %v346_v51 }
  0xa6   : > { %v548_v36 = vsel %vm538_vm3, %v1492_v9, %v344_v8  ;;  %v574_v9 = vsel %vm572_vm5, %v557_v13, %v410_v39  ;;  %v567_v32 = vsel %vm555_vm4, %v550_v21, %v403_v37  ;;  %p1286_p6 = pnand %p1285_p5, %p1279_p1 }
  0xa7   : > { %v565_v5 = vsel %vm555_vm4, %v548_v36, %v401_v25 }
  0xa8   : > { %v420_v52 = vpop.permute.xlu1 %419  ;;  %v582_v15 = vsel %vm572_vm5, %v565_v5, %v418_v38 }
  0xa9   : > { %v412_v53 = vpop.permute.xlu0 %411  ;;  %v584_v3 = vsel %vm572_vm5, %v567_v32, %v420_v52 }
  0xaa   : > { %v576_v7 = vsel %vm572_vm5, %v559_v33, %v412_v53 }
  0xac   : > { %v446_v57 = vpop.permute.xlu1 %445 }
  0xad   : > { %v438_v58 = vpop.permute.xlu0 %437  ;;  %v599_v16 = vsel %vm589_vm6, %v582_v15, %v446_v57 }
  0xae   : > { %v591_v14 = vsel %vm589_vm6, %v574_v9, %v438_v58 }
  0xb0   : > { %v448_v44 = vpop.permute.xlu1 %447 }
  0xb1   : > { %v440_v59 = vpop.permute.xlu0 %439  ;;  %v601_v35 = vsel %vm589_vm6, %v584_v3, %v448_v44 }
  0xb2   : > { %v593_v42 = vsel %vm589_vm6, %v576_v7, %v440_v59 }
  0xb4   : > { %v466_v60 = vpop.permute.xlu1 %465 }
  0xb5   : > { %v458_v31 = vpop.permute.xlu0 %457  ;;  %v616_v18 = vsel %vm606_vm7, %v599_v16, %v466_v60 }
  0xb6   : > { %v608_v19 = vsel %vm606_vm7, %v591_v14, %v458_v31 }
  0xb8   : > { %v468_v61 = vpop.permute.xlu1 %467 }
  0xb9   : > { %v460_v62 = vpop.permute.xlu0 %459  ;;  %v618_v43 = vsel %vm606_vm7, %v601_v35, %v468_v61 }
  0xba   : > { %v610_v45 = vsel %vm606_vm7, %v593_v42, %v460_v62 }
  0xbc   : > { %v483_v63 = vpop.permute.xlu1 %482 }
  0xbd   : > { %v475_v0 = vpop.permute.xlu0 %474  ;;  %v633_v20 = vsel %vm623_vm8, %v616_v18, %v483_v63 }
  0xbe   : > { %v625_v22 = vsel %vm623_vm8, %v608_v19, %v475_v0 }
  0xc0   : > { %v485_v54 = vpop.permute.xlu1 %484 }
  0xc1   : > { %v477_v1 = vpop.permute.xlu0 %476  ;;  %v635_v46 = vsel %vm623_vm8, %v618_v43, %v485_v54 }
  0xc2   : > { %v627_v47 = vsel %vm623_vm8, %v610_v45, %v477_v1 }
  0xc4   : > { %v511_v4 = vpop.permute.xlu1 %510 }
  0xc5   : > { %v503_v12 = vpop.permute.xlu0 %502  ;;  %v650_v23 = vsel %vm640_vm9, %v633_v20, %v511_v4 }
  0xc6   : > { %v642_v27 = vsel %vm640_vm9, %v625_v22, %v503_v12 }
  0xc8   : > { %v513_v40 = vpop.permute.xlu1 %512 }
  0xc9   : > { %v505_v17 = vpop.permute.xlu0 %504  ;;  %v652_v38 = vsel %vm640_vm9, %v635_v46, %v513_v40 }
  0xca   : > { %v644_v25 = vsel %vm640_vm9, %v627_v47, %v505_v17 }
  0xcc   : > { %v531_v24 = vpop.permute.xlu1 %530 }
  0xcd   : > { %v523_v28 = vpop.permute.xlu0 %522  ;;  %v667_v29 = vsel %vm657_vm10, %v650_v23, %v531_v24 }
  0xce   : > { %v659_v30 = vsel %vm657_vm10, %v642_v27, %v523_v28  ;;  %1112 = vmatprep.mubr.msk.bf16.mxu1 %vm701_vm11, %v667_v29 }
  0xcf   : > { %1104 = vmatprep.mubr.msk.bf16.mxu0 %vm701_vm11, %v659_v30 }
  0xd0   : > { %v348_v34 = vpop.permute.xlu1 %347 }
  0xd1   : > { %v340_v41 = vpop.permute.xlu0 %339  ;;  %v552_v51 = vsel %vm538_vm3, %v1536_v55, %v348_v34 }
  0xd2   : > { %v544_v52 = vsel %vm538_vm3, %v1538_v56, %v340_v41 }
  0xd4   : > { %v533_v39 = vpop.permute.xlu1 %532 }
  0xd5   : > { %v669_v48 = vsel %vm657_vm10, %v652_v38, %v533_v39  ;;  %v525_v37 = vpop.permute.xlu0 %524 }
  0xd6   : > { %v661_v49 = vsel %vm657_vm10, %v644_v25, %v525_v37  ;;  %1113 = vmatmul.mubr.msk.bf16.vlgmr.msra.gmra.mrb[0].mxu1 %vm701_vm11, %v669_v48  ;;  %v1819_v37 = vld [vmem:[%s1949_s2] ss:$0 sm:$0xff] }
  0xd7   : > { %1105 = vmatmul.mubr.msk.bf16.vlgmr.msra.gmra.mrb[0].mxu0 %vm701_vm11, %v661_v49 }
  0xd8   : > { %v350_v10 = vpop.permute.xlu1 %349 }
  0xd9   : > { %v342_v50 = vpop.permute.xlu0 %341  ;;  %v554_v44 = vsel %vm538_vm3, %v1628_v6, %v350_v10 }
  0xda   : > { %v546_v60 = vsel %vm538_vm3, %v1633_v11, %v342_v50 }
  0xdc   : > { %v405_v8 = vpop.permute.xlu1 %404 }
  0xdd   : > { %v569_v53 = vsel %vm555_vm4, %v552_v51, %v405_v8  ;;  %v397_v57 = vpop.permute.xlu0 %396 }
  0xde   : > { %v561_v58 = vsel %vm555_vm4, %v544_v52, %v397_v57 }
  0xe0   : > { %v407_v59 = vpop.permute.xlu1 %406 }
  0xe1   : > { %v571_v31 = vsel %vm555_vm4, %v554_v44, %v407_v59  ;;  %v399_v61 = vpop.permute.xlu0 %398 }
  0xe2   : > { %v563_v55 = vsel %vm555_vm4, %v546_v60, %v399_v61 }
  0xe4   : > { %v422_v62 = vpop.permute.xlu1 %421 }
  0xe5   : > { %v414_v63 = vpop.permute.xlu0 %413  ;;  %v586_v17 = vsel %vm572_vm5, %v569_v53, %v422_v62 }
  0xe6   : > { %v578_v18 = vsel %vm572_vm5, %v561_v58, %v414_v63 }
  0xe8   : > { %v424_v56 = vpop.permute.xlu1 %423 }
  0xe9   : > { %v416_v0 = vpop.permute.xlu0 %415  ;;  %v588_v26 = vsel %vm572_vm5, %v571_v31, %v424_v56 }
  0xea   : > { %v580_v30 = vsel %vm572_vm5, %v563_v55, %v416_v0 }
  0xec   : > { %v450_v54 = vpop.permute.xlu1 %449 }
  0xed   : > { %v442_v1 = vpop.permute.xlu0 %441  ;;  %v603_v19 = vsel %vm589_vm6, %v586_v17, %v450_v54 }
  0xee   : > { %v595_v21 = vsel %vm589_vm6, %v578_v18, %v442_v1 }
  0xf0   : > { %v452_v36 = vpop.permute.xlu1 %451 }
  0xf1   : > { %v444_v2 = vpop.permute.xlu0 %443  ;;  %v605_v32 = vsel %vm589_vm6, %v588_v26, %v452_v36 }
  0xf2   : > { %v597_v7 = vsel %vm589_vm6, %v580_v30, %v444_v2 }
  0xf4   : > { %v470_v4 = vpop.permute.xlu1 %469 }
  0xf5   : > { %v462_v5 = vpop.permute.xlu0 %461  ;;  %v620_v22 = vsel %vm606_vm7, %v603_v19, %v470_v4 }
  0xf6   : > { %v612_v23 = vsel %vm606_vm7, %v595_v21, %v462_v5 }
  0xf8   : > { %v472_v6 = vpop.permute.xlu1 %471 }
  0xf9   : > { %v464_v12 = vpop.permute.xlu0 %463  ;;  %v622_v35 = vsel %vm606_vm7, %v605_v32, %v472_v6 }
  0xfa   : > { %v614_v42 = vsel %vm606_vm7, %v597_v7, %v464_v12 }
  0xfc   : > { %v487_v13 = vpop.permute.xlu1 %486 }
  0xfd   : > { %v479_v15 = vpop.permute.xlu0 %478  ;;  %v637_v24 = vsel %vm623_vm8, %v620_v22, %v487_v13 }
  0xfe   : > { %v629_v27 = vsel %vm623_vm8, %v612_v23, %v479_v15 }
 0x100   : > { %v489_v11 = vpop.permute.xlu1 %488 }
 0x101   : > { %v481_v40 = vpop.permute.xlu0 %480  ;;  %v639_v43 = vsel %vm623_vm8, %v622_v35, %v489_v11 }
 0x102   : > { %v631_v45 = vsel %vm623_vm8, %v614_v42, %v481_v40 }
 0x104   : > { %v515_v16 = vpop.permute.xlu1 %514 }
 0x105   : > { %v507_v9 = vpop.permute.xlu0 %506  ;;  %v654_v28 = vsel %vm640_vm9, %v637_v24, %v515_v16 }
 0x106   : > { %v646_v3 = vsel %vm640_vm9, %v629_v27, %v507_v9 }
 0x108   : > { %v517_v14 = vpop.permute.xlu1 %516 }
 0x109   : > { %v509_v20 = vpop.permute.xlu0 %508  ;;  %v656_v46 = vsel %vm640_vm9, %v639_v43, %v517_v14 }
 0x10a   : > { %v648_v38 = vsel %vm640_vm9, %v631_v45, %v509_v20 }
 0x10c   : > { %v535_v29 = vpop.permute.xlu1 %534 }
 0x10d   : > { %v671_v33 = vsel %vm657_vm10, %v654_v28, %v535_v29  ;;  %v527_v34 = vpop.permute.xlu0 %526 }
 0x10e   : > { %v663_v41 = vsel %vm657_vm10, %v646_v3, %v527_v34  ;;  %1116 = vmatprep.mubr.msk.bf16.mxu1 %vm701_vm11, %v671_v33 }
 0x10f   : > { %1108 = vmatprep.mubr.msk.bf16.mxu0 %vm701_vm11, %v663_v41 }
 0x110   : > { %v537_v47 = vpop.permute.xlu1 %536 }
 0x111   : > { %v673_v39 = vsel %vm657_vm10, %v656_v46, %v537_v47  ;;  %v529_v25 = vpop.permute.xlu0 %528 }
 0x112   : > { %v665_v48 = vsel %vm657_vm10, %v648_v38, %v529_v25  ;;  %1117 = vmatmul.mubr.msk.bf16.gmra.mrb[4].mxu1 %vm701_vm11, %v673_v39 }
 0x113   : > { %1109 = vmatmul.mubr.msk.bf16.gmra.mrb[4].mxu0 %vm701_vm11, %v665_v48 }
 0x1a9   : > { %v1114_v49 = vpop.f32.mrb[0].mxu1 }
 0x1aa   : > { %v1106_v10 = vpop.f32.mrb[0].mxu0  ;;  %v797_v50 = vadd.f32 %v1114_v49, %v1819_v37  ;;  %v788_v51 = vpop.f32.mrb[1].mxu1 }
 0x1ab   : > { %v765_v8 = vadd.f32 %v1106_v10, %v1819_v37  ;;  %v756_v52 = vpop.f32.mrb[1].mxu0  ;;  %v1824_v53 = vadd.f32 %v1819_v37, %v788_v51  ;;  %v1115_v57 = vpop.f32.mrb[2].mxu1 }
 0x1ac   : > { %v1073_v58 = vmul.f32 -1.442695, %v797_v50  ;;  %v757_v44 = vadd.f32 %v1819_v37, %v756_v52  ;;  %v1107_v59 = vpop.f32.mrb[2].mxu0  ;;  %v1828_v60 = vadd.f32 %v1115_v57, %v1819_v37  ;;  %v791_v31 = vpop.f32.mrb[3].mxu1 }
 0x1ad   : > { %v1065_v61 = vmul.f32 -1.442695, %v765_v8  ;;  %v1071_v55 = vmul.f32 -1.442695, %v1824_v53  ;;  %v768_v62 = vadd.f32 %v1107_v59, %v1819_v37  ;;  %v759_v63 = vpop.f32.mrb[3].mxu0  ;;  %v1833_v56 = vadd.f32 %v1819_v37, %v791_v31 }
 0x1ae   : > { %1212 = vpow2.f32 %v1073_v58  ;;  %v1063_v0 = vmul.f32 -1.442695, %v757_v44  ;;  %v760_v54 = vadd.f32 %v1819_v37, %v759_v63  ;;  %v1074_v36 = vmul.f32 -1.442695, %v1828_v60 }
 0x1af   : > { %1214 = vpow2.f32 %v1065_v61  ;;  %v1066_v1 = vmul.f32 -1.442695, %v768_v62  ;;  %v1072_v4 = vmul.f32 -1.442695, %v1833_v56 }
 0x1b0   : > { %1216 = vpow2.f32 %v1063_v0  ;;  %v1064_v2 = vmul.f32 -1.442695, %v760_v54 }
 0x1b1   : > { %1218 = vpow2.f32 %v1071_v55 }
 0x1b2   : > { %1220 = vpow2.f32 %v1066_v1 }
 0x1b3   : > { %1222 = vpow2.f32 %v1074_v36 }
 0x1b4   : > { %1224 = vpow2.f32 %v1064_v2 }
 0x1b5   : > { %1226 = vpow2.f32 %v1072_v4 }
 0x1b8   : > { %v1213_v5 = vpop.eup %1212 }
 0x1b9   : > { %v1215_v6 = vpop.eup %1214  ;;  %v877_v12 = vadd.f32 1.0, %v1213_v5 }
 0x1ba   : > { %v1217_v13 = vpop.eup %1216  ;;  %v869_v15 = vadd.f32 1.0, %v1215_v6 }
 0x1bb   : > { %v1219_v11 = vpop.eup %1218  ;;  %1228 = vrcp.f32 %v877_v12  ;;  %v867_v40 = vadd.f32 1.0, %v1217_v13 }
 0x1bc   : > { %v1221_v16 = vpop.eup %1220  ;;  %1230 = vrcp.f32 %v869_v15  ;;  %v875_v9 = vadd.f32 1.0, %v1219_v11 }
 0x1bd   : > { %v1223_v17 = vpop.eup %1222  ;;  %1232 = vrcp.f32 %v867_v40  ;;  %v870_v14 = vadd.f32 1.0, %v1221_v16 }
 0x1be   : > { %v1225_v18 = vpop.eup %1224  ;;  %1234 = vrcp.f32 %v875_v9  ;;  %v878_v19 = vadd.f32 1.0, %v1223_v17 }
 0x1bf   : > { %v1227_v20 = vpop.eup %1226  ;;  %1236 = vrcp.f32 %v870_v14  ;;  %v868_v21 = vadd.f32 1.0, %v1225_v18 }
 0x1c0   : > { %1238 = vrcp.f32 %v878_v19  ;;  %v876_v22 = vadd.f32 1.0, %v1227_v20 }
 0x1c1   : > { %1240 = vrcp.f32 %v868_v21 }
 0x1c2   : > { %1242 = vrcp.f32 %v876_v22 }
 0x1c5   : > { %v1229_v23 = vpop.eup %1228 }
 0x1c6   : > { %v1231_v24 = vpop.eup %1230  ;;  %v925_v26 = vmul.f32 %v1229_v23, %v797_v50 }
 0x1c7   : > { %v1233_v27 = vpop.eup %1232  ;;  %v917_v28 = vmul.f32 %v1231_v24, %v765_v8 }
 0x1c8   : > { %v1235_v29 = vpop.eup %1234  ;;  %941 = vst [vmem:[%s1841_s28 + $0x50] sm:$0xff] %v925_v26  ;;  %v915_v30 = vmul.f32 %v1233_v27, %v757_v44 }
 0x1c9   : > { %v1237_v32 = vpop.eup %1236  ;;  %933 = vst [vmem:[%s1841_s28 + $0x10] sm:$0xff] %v917_v28  ;;  %v923_v3 = vmul.f32 %v1235_v29, %v1824_v53 }
 0x1ca   : > { %v1239_v33 = vpop.eup %1238  ;;  %931 = vst [vmem:[%s1841_s28] sm:$0xff] %v915_v30  ;;  %v918_v34 = vmul.f32 %v1237_v32, %v768_v62 }
 0x1cb   : > { %v1241_v7 = vpop.eup %1240  ;;  %939 = vst [vmem:[%s1841_s28 + $0x40] sm:$0xff] %v923_v3  ;;  %v926_v35 = vmul.f32 %v1239_v33, %v1828_v60 }
 0x1cc   : > { %v1243_v41 = vpop.eup %1242  ;;  %934 = vst [vmem:[%s1841_s28 + $0x18] sm:$0xff] %v918_v34  ;;  %v916_v42 = vmul.f32 %v1241_v7, %v760_v54 }
 0x1cd   : > { %942 = vst [vmem:[%s1841_s28 + $0x58] sm:$0xff] %v926_v35  ;;  %v924_v43 = vmul.f32 %v1243_v41, %v1833_v56 }
 0x1ce   : > { %932 = vst [vmem:[%s1841_s28 + $0x8] sm:$0xff] %v916_v42 }
 0x1cf   : > { %940 = vst [vmem:[%s1841_s28 + $0x48] sm:$0xff] %v924_v43 }
 0x1e5   : > { %v1118_v45 = vpop.f32.mrb[4].mxu1 }
 0x1e6   : > { %v1110_v46 = vpop.f32.mrb[4].mxu0  ;;  %v813_v47 = vadd.f32 %v1118_v45, %v1819_v37  ;;  %v804_v38 = vpop.f32.mrb[5].mxu1 }
 0x1e7   : > { %v781_v39 = vadd.f32 %v1110_v46, %v1819_v37  ;;  %v772_v25 = vpop.f32.mrb[5].mxu0  ;;  %v1857_v48 = vadd.f32 %v1819_v37, %v804_v38  ;;  %v1119_v49 = vpop.f32.mrb[6].mxu1 }
 0x1e8   : > { %v1077_v10 = vmul.f32 -1.442695, %v813_v47  ;;  %v773_v50 = vadd.f32 %v1819_v37, %v772_v25  ;;  %v1111_v51 = vpop.f32.mrb[6].mxu0  ;;  %v1861_v8 = vadd.f32 %v1119_v49, %v1819_v37  ;;  %v807_v52 = vpop.f32.mrb[7].mxu1 }
 0x1e9   : > { %v1069_v53 = vmul.f32 -1.442695, %v781_v39  ;;  %v1075_v57 = vmul.f32 -1.442695, %v1857_v48  ;;  %v784_v58 = vadd.f32 %v1111_v51, %v1819_v37  ;;  %v775_v44 = vpop.f32.mrb[7].mxu0  ;;  %v1866_v59 = vadd.f32 %v1819_v37, %v807_v52 }
 0x1ea   : > { %1244 = vpow2.f32 %v1077_v10  ;;  %v1067_v60 = vmul.f32 -1.442695, %v773_v50  ;;  %v776_v31 = vadd.f32 %v1819_v37, %v775_v44  ;;  %v1078_v55 = vmul.f32 -1.442695, %v1861_v8 }
 0x1eb   : > { %1246 = vpow2.f32 %v1069_v53  ;;  %v1070_v61 = vmul.f32 -1.442695, %v784_v58  ;;  %v1076_v63 = vmul.f32 -1.442695, %v1866_v59 }
 0x1ec   : > { %1248 = vpow2.f32 %v1067_v60  ;;  %v1068_v62 = vmul.f32 -1.442695, %v776_v31 }
 0x1ed   : > { %1250 = vpow2.f32 %v1075_v57 }
 0x1ee   : > { %1252 = vpow2.f32 %v1070_v61 }
 0x1ef   : > { %1254 = vpow2.f32 %v1078_v55 }
 0x1f0   : > { %1256 = vpow2.f32 %v1068_v62 }
 0x1f1   : > { %1258 = vpow2.f32 %v1076_v63 }
 0x1f4   : > { %v1245_v56 = vpop.eup %1244 }
 0x1f5   : > { %v1247_v0 = vpop.eup %1246  ;;  %v881_v54 = vadd.f32 1.0, %v1245_v56 }
 0x1f6   : > { %v1249_v1 = vpop.eup %1248  ;;  %v873_v36 = vadd.f32 1.0, %v1247_v0 }
 0x1f7   : > { %v1251_v2 = vpop.eup %1250  ;;  %1260 = vrcp.f32 %v881_v54  ;;  %v871_v37 = vadd.f32 1.0, %v1249_v1 }
 0x1f8   : > { %v1253_v4 = vpop.eup %1252  ;;  %1262 = vrcp.f32 %v873_v36  ;;  %v879_v5 = vadd.f32 1.0, %v1251_v2 }
 0x1f9   : > { %v1255_v6 = vpop.eup %1254  ;;  %1264 = vrcp.f32 %v871_v37  ;;  %v874_v12 = vadd.f32 1.0, %v1253_v4 }
 0x1fa   : > { %v1257_v13 = vpop.eup %1256  ;;  %1266 = vrcp.f32 %v879_v5  ;;  %v882_v15 = vadd.f32 1.0, %v1255_v6 }
 0x1fb   : > { %v1259_v11 = vpop.eup %1258  ;;  %1268 = vrcp.f32 %v874_v12  ;;  %v872_v40 = vadd.f32 1.0, %v1257_v13 }
 0x1fc   : > { %1270 = vrcp.f32 %v882_v15  ;;  %v880_v16 = vadd.f32 1.0, %v1259_v11 }
 0x1fd   : > { %1272 = vrcp.f32 %v872_v40 }
 0x1fe   : > { %1274 = vrcp.f32 %v880_v16 }
 0x201   : > { %v1261_v9 = vpop.eup %1260 }
 0x202   : > { %v1263_v17 = vpop.eup %1262  ;;  %v929_v14 = vmul.f32 %v1261_v9, %v813_v47 }
 0x203   : > { %v1265_v18 = vpop.eup %1264  ;;  %v921_v19 = vmul.f32 %v1263_v17, %v781_v39 }
 0x204   : > { %v1267_v20 = vpop.eup %1266  ;;  %945 = vst [vmem:[%s1841_s28 + $0x70] sm:$0xff] %v929_v14  ;;  %v919_v21 = vmul.f32 %v1265_v18, %v773_v50 }
 0x205   : > { %v1269_v22 = vpop.eup %1268  ;;  %937 = vst [vmem:[%s1841_s28 + $0x30] sm:$0xff] %v921_v19  ;;  %v927_v23 = vmul.f32 %v1267_v20, %v1857_v48 }
 0x206   : > { %v1271_v24 = vpop.eup %1270  ;;  %935 = vst [vmem:[%s1841_s28 + $0x20] sm:$0xff] %v919_v21  ;;  %v922_v26 = vmul.f32 %v1269_v22, %v784_v58 }
 0x207   : > { %v1273_v27 = vpop.eup %1272  ;;  %943 = vst [vmem:[%s1841_s28 + $0x60] sm:$0xff] %v927_v23  ;;  %v930_v28 = vmul.f32 %v1271_v24, %v1861_v8 }
 0x208   : > { %v1275_v29 = vpop.eup %1274  ;;  %938 = vst [vmem:[%s1841_s28 + $0x38] sm:$0xff] %v922_v26  ;;  %v920_v30 = vmul.f32 %v1273_v27, %v776_v31 }
 0x209   : > { %946 = vst [vmem:[%s1841_s28 + $0x78] sm:$0xff] %v930_v28  ;;  %v928_v32 = vmul.f32 %v1275_v29, %v1866_v59 }
 0x20a   : > { %936 = vst [vmem:[%s1841_s28 + $0x28] sm:$0xff] %v920_v30 }
 0x20b   : > { %944 = vst [vmem:[%s1841_s28 + $0x68] sm:$0xff] %v928_v32 }
 0x20c   : > { %1289 = shalt.err (!%p1286_p6)
}
 0x20d   : > { %s1290_s24 = scalar_lea.hbm %s1884_s8, 2048  ;;  %s1294_s4 = scalar_lea.hbm %s1950_s3, 8192 }
 0x20e   : > { %p1291_p7 = scmp.ne.s32.totalorder %s1884_s8, %s1290_s24  ;;  %p1295_p11 = scmp.lt.u32.totalorder %s1884_s8, %s1950_s3 }
 0x20f   : > { %p1296_p12 = scmp.lt.u32.totalorder %s1294_s4, %s1290_s24  ;;  %p1298_p0 = scmp.lt.u32.totalorder %s1290_s24, %s1884_s8 }
 0x210   : > { %p1292_p9 = pnand %p1291_p7, %p1453_p3 }
 0x211   : > { %p1297_p13 = por %p1296_p12, %p1295_p11 }
 0x212   : > { %p1293_p10 = pneg %p1292_p9 }
 0x213   : > { %p1299_p1 = por %p1298_p0, %p1297_p13 }
 0x215   : > { %p1300_p2 = pnand %p1299_p1, %p1293_p10 }
 0x217   : > { %1303 = shalt.err (!%p1300_p2)
}
 0x218   : > { %s1381_s6 = smov 128  }
 0x219   : > { %1129 = dma.vmem_to_hbm [thread:$0]  (%p1453_p3), %s1888_s16, 2048, %s1884_s8, %s1894_s9, %s1381_s6, %s1381_s6, %s1373_s20  }
 0x21a PF: > { %p1135_p4 = scmp.ge.s32.totalorder %s1370_s19, 2  ;;  %s979_s7 = sand.u32 1, %s1342_s12  }
 0x21b   : > { %s980_s10 = scalar_lea.sflag [#allocation3], %s979_s7 }
 0x21c   : > { %p1132_p5 = pnand %p1135_p4, %p1462_p8 }
 0x21e   : > { %1337 = dma.done.wait (!%p1132_p5), %s980_s10, 2048  }
 0x21f   : > { %1339 = vsyncadd (!%p1132_p5), %s980_s10, 4294965248  ;;  %s16_s19 = sadd.s32 1, %s1370_s19   ;;  %s1953_s12 = smov %s1346_s13 }
 0x220   : > { %p13_p6 = scmp.ge.s32.totalorder %s16_s19, 6   ;;  %s1954_s13 = smov %s1350_s14 }
 0x221   : > { %s1955_s14 = smov %s1471_s30  ;;  %s1956_s15 = smov %s1362_s17 }
 0x222   : > { %s1957_s16 = smov %s1366_s18  ;;  %s1958_s17 = smov %s1961_s22 }
 0x223   : > { %s1959_s18 = smov %s1965_s23  ;;  %15 = sbr.rel (!%p13_p6) target bundleno = 5 (0x5), region = 68 }
 0x22a   :  { %985 = vsyncpa [#allocation3], 1 }
 0x22b   :  { %987 = vsyncpa [#allocation3 + $0x1], 1 }

</bundles_post_ra>
